<compile_context>
chip_gen: v5e
topology: v5e:2x2
jax: 0.10.0
libtpu: 0.0.40
codegen_flags: <defaults>
</compile_context>

<pallas_src>
import jax
import jax.numpy as jnp
from jax import lax
from jax.experimental import pallas as pl
from jax.experimental.pallas import tpu as pltpu

IN_FEATS = 144    # GCNConv in_channels  (x_dim + edge_dim)
OUT_FEATS = 168   # GCNConv out_channels
OUT_PAD = 256     # OUT_FEATS padded to a multiple of 128 (lane-dense stores)

# Set True on v6e/v7x for ~3x MXU throughput (loosen allclose tolerance to ~1e-2).
USE_BF16_MXU = False


def _mxu(v):
    """Cast MXU inputs to bf16 if enabled; accumulation stays f32 either way."""
    return v.astype(jnp.bfloat16) if USE_BF16_MXU else v


def gcn_node_kernel(dst_col_ref, dst_row_ref, src_col_ref,
                    x_ref, ea_ref, wx_ref, we_ref, b_ref, o_ref):
    """out = relu( A_hat @ [x[col] | edge_attr] @ W^T + b ), fully fused.

    A_hat = D^-1/2 (A + I) D^-1/2 is built in-kernel from the edge indices and
    applied as row-scale -> (A+I) matmul -> row-scale (no explicit transpose).
    """
    f32 = jnp.float32
    E = ea_ref.shape[0]
    N = x_ref.shape[0]

    dst_c = dst_col_ref[...]          # [E, 1] int32  (col == edge_index[1])
    dst_r = dst_row_ref[...]          # [1, E] int32
    src_c = src_col_ref[...]          # [E, 1] int32  (row == edge_index[0])

    # Gather matrix (fused x[col]): sel[e, n] = 1 iff col[e] == n.
    sel = (dst_c == lax.broadcasted_iota(jnp.int32, (E, N), 1)).astype(f32)
    # One-hot(src): oh_src[e, s] = 1 iff src[e] == s.
    oh_src = (src_c == lax.broadcasted_iota(jnp.int32, (E, E), 1)).astype(f32)
    # Transposed one-hot(dst): oh_dst_t[d, e] = 1 iff dst[e] == d.
    oh_dst_t = (lax.broadcasted_iota(jnp.int32, (E, E), 0) == dst_r).astype(f32)

    # A + I with unit edge weights (self loops added like PyG gcn_norm).
    eye = (lax.broadcasted_iota(jnp.int32, (E, E), 0)
           == lax.broadcasted_iota(jnp.int32, (E, E), 1)).astype(f32)
    a_plus = jnp.dot(_mxu(oh_dst_t), _mxu(oh_src),
                     preferred_element_type=f32) + eye          # [E, E]

    # Symmetric normalization factors (deg >= 1 thanks to self loops).
    deg = jnp.sum(a_plus, axis=1, keepdims=True)                 # [E, 1]
    dinv = jnp.where(deg > 0.0, lax.rsqrt(deg), 0.0)             # [E, 1]

    # Fused gather on the MXU: x[col] = sel @ x.
    x_col = jnp.dot(_mxu(sel), _mxu(x_ref[...]),
                    preferred_element_type=f32)                  # [E, XD]

    # Aggregate in the (narrower) input feature space: A_hat @ feat, done as
    # dinv-row-scale -> (A+I) matmul -> dinv-row-scale.
    ax = dinv * jnp.dot(_mxu(a_plus), _mxu(dinv * x_col),
                        preferred_element_type=f32)              # [E, XD]
    ae = dinv * jnp.dot(_mxu(a_plus), _mxu(dinv * ea_ref[...]),
                        preferred_element_type=f32)              # [E, ED]

    # Project with the split weight; contracting ((1,),(1,)) == "@ W^T" with no
    # wrapper-side transpose.  Output channels are zero-padded to OUT_PAD lanes.
    dn = (((1,), (1,)), ((), ()))
    hx = lax.dot_general(_mxu(ax), _mxu(wx_ref[...]), dn,
                         preferred_element_type=f32)             # [E, OUT_PAD]
    he = lax.dot_general(_mxu(ae), _mxu(we_ref[...]), dn,
                         preferred_element_type=f32)             # [E, OUT_PAD]

    # Epilogue in f32 (bias add + ReLU); lane-dense unmasked store.
    out = hx + he + b_ref[...]
    o_ref[...] = jnp.maximum(out, 0.0).astype(o_ref.dtype)


def node_model_1(x, edge_index, edge_attr, weight, bias):
    """Mirrors NodeModel_1.forward.

    NOTE: like the original module, this assumes every edge_index value indexes a
    valid row of the concatenated features (i.e. values < E); see __main__ assert.
    """
    N, XD = x.shape
    E, ED = edge_attr.shape

    src = edge_index[0].astype(jnp.int32)
    dst = edge_index[1].astype(jnp.int32)     # col
    dst_col = dst.reshape(E, 1)
    dst_row = dst.reshape(1, E)
    src_col = src.reshape(E, 1)

    # Split the GCN weight along the concat boundary; zero-pad out-channels to a
    # lane-dense 256 (padded columns produce zeros and are sliced away below).
    pad = OUT_PAD - OUT_FEATS
    w_x = jnp.pad(weight[:, :XD].astype(jnp.float32), ((0, pad), (0, 0)))
    w_e = jnp.pad(weight[:, XD:].astype(jnp.float32), ((0, pad), (0, 0)))
    b_p = jnp.pad(bias.astype(jnp.float32), (0, pad)).reshape(1, OUT_PAD)

    grid_spec = pl.GridSpec(
        grid=(1,),
        in_specs=[
            pl.BlockSpec((E, 1), lambda i: (0, 0)),          # dst (col), column form
            pl.BlockSpec((1, E), lambda i: (0, 0)),          # dst, row form
            pl.BlockSpec((E, 1), lambda i: (0, 0)),          # src, column form
            pl.BlockSpec((N, XD), lambda i: (0, 0)),         # x
            pl.BlockSpec((E, ED), lambda i: (0, 0)),         # edge_attr
            pl.BlockSpec((OUT_PAD, XD), lambda i: (0, 0)),   # W_x (padded)
            pl.BlockSpec((OUT_PAD, ED), lambda i: (0, 0)),   # W_e (padded)
            pl.BlockSpec((1, OUT_PAD), lambda i: (0, 0)),    # bias (padded)
        ],
        out_specs=pl.BlockSpec((E, OUT_PAD), lambda i: (0, 0)),
    )
    out_p = pl.pallas_call(
        gcn_node_kernel,
        out_shape=jax.ShapeDtypeStruct((E, OUT_PAD), jnp.float32),
        grid_spec=grid_spec,
        compiler_params=pltpu.CompilerParams(
            dimension_semantics=("arbitrary",)),
        # TODO(synk): for large E, switch to a row-tiled ("parallel") grid with a
        # K-reduction accumulator; the dense E^2 A+I is the VMEM ceiling (~4k on v7x).
    )(dst_col, dst_row, src_col,
      x.astype(jnp.float32), edge_attr.astype(jnp.float32), w_x, w_e, b_p)
    return out_p[:, :OUT_FEATS]


def reference(x, edge_index, edge_attr, weight, bias):
    """Plain-JAX ground truth (scatter-built dense A_hat), matches PyG gcn_norm."""
    out = jnp.concatenate([x[edge_index[1]], edge_attr], axis=1)
    e = out.shape[0]
    src = jnp.concatenate([edge_index[0], jnp.arange(e, dtype=jnp.int32)])
    dst = jnp.concatenate([edge_index[1], jnp.arange(e, dtype=jnp.int32)])
    w = jnp.ones(src.shape[0], dtype=jnp.float32)
    deg = jnp.zeros((e,), jnp.float32).at[dst].add(w)
    dinv = jnp.where(deg > 0, deg ** -0.5, 0.0)
    norm = dinv[src] * w * dinv[dst]
    adj = jnp.zeros((e, e), jnp.float32).at[dst, src].add(norm)
    return jnp.maximum(adj @ (out @ weight.T) + bias[None, :], 0.0)


if __name__ == "__main__":
    key = jax.random.PRNGKey(0)
    k_x, k_ea, k_ei, k_w, k_b = jax.random.split(key, 5)

    N = 16          # number of nodes
    E = 16          # number of edges (== N so GCNConv indexing stays valid)
    X_DIM = 80
    EA_DIM = 64     # 80 + 64 = 144 = GCNConv in_channels

    x = jax.random.normal(k_x, (N, X_DIM), dtype=jnp.float32)
    edge_attr = jax.random.normal(k_ea, (E, EA_DIM), dtype=jnp.float32)
    edge_index = jax.random.randint(k_ei, (2, E), 0, N, dtype=jnp.int32)
    # Semantics inherited from the original module: edge indices must address
    # rows of the concatenated [E, 144] features.
    assert int(edge_index.max()) < E

    # Deterministic GCNConv parameters (glorot-ish weight, small bias).
    limit = (6.0 / (IN_FEATS + OUT_FEATS)) ** 0.5
    weight = jax.random.uniform(k_w, (OUT_FEATS, IN_FEATS),
                                minval=-limit, maxval=limit, dtype=jnp.float32)
    bias = jax.random.uniform(k_b, (OUT_FEATS,),
                              minval=-0.1, maxval=0.1, dtype=jnp.float32)

    fwd = jax.jit(node_model_1)
    out = jax.block_until_ready(fwd(x, edge_index, edge_attr, weight, bias))

    ref = reference(x, edge_index, edge_attr, weight, bias)
    assert out.shape == (E, OUT_FEATS)
    tol = 1e-2 if USE_BF16_MXU else 1e-4
    assert jnp.allclose(out, ref, atol=tol, rtol=tol)

    print("KERNEL_OK")
</pallas_src>

<mosaic_0001>
module attributes {stable_mosaic.version = 11 : i64} {
  func.func @gcn_node_kernel(%arg0: i32, %arg1: memref<16x1xi32, #tpu.memory_space<vmem>>, %arg2: memref<1x16xi32, #tpu.memory_space<vmem>>, %arg3: memref<16x1xi32, #tpu.memory_space<vmem>>, %arg4: memref<16x80xf32, #tpu.memory_space<vmem>>, %arg5: memref<16x64xf32, #tpu.memory_space<vmem>>, %arg6: memref<256x80xf32, #tpu.memory_space<vmem>>, %arg7: memref<256x64xf32, #tpu.memory_space<vmem>>, %arg8: memref<1x256xf32, #tpu.memory_space<vmem>>, %arg9: memref<16x256xf32, #tpu.memory_space<vmem>>) attributes {dimension_semantics = [#tpu.dimension_semantics<arbitrary>], iteration_bounds = array<i64: 1>, scalar_prefetch = 0 : i64, scratch_operands = 0 : i64, tpu.core_type = #tpu.core_type<tc>, window_params = [{pipeline_mode = #tpu.pipeline_mode<synchronous>, transform_indices = @transform_0, window_bounds = array<i64: 16, 1>}, {pipeline_mode = #tpu.pipeline_mode<synchronous>, transform_indices = @transform_1, window_bounds = array<i64: 1, 16>}, {pipeline_mode = #tpu.pipeline_mode<synchronous>, transform_indices = @transform_2, window_bounds = array<i64: 16, 1>}, {pipeline_mode = #tpu.pipeline_mode<synchronous>, transform_indices = @transform_3, window_bounds = array<i64: 16, 80>}, {pipeline_mode = #tpu.pipeline_mode<synchronous>, transform_indices = @transform_4, window_bounds = array<i64: 16, 64>}, {pipeline_mode = #tpu.pipeline_mode<synchronous>, transform_indices = @transform_5, window_bounds = array<i64: 256, 80>}, {pipeline_mode = #tpu.pipeline_mode<synchronous>, transform_indices = @transform_6, window_bounds = array<i64: 256, 64>}, {pipeline_mode = #tpu.pipeline_mode<synchronous>, transform_indices = @transform_7, window_bounds = array<i64: 1, 256>}, {pipeline_mode = #tpu.pipeline_mode<synchronous>, transform_indices = @transform_8, window_bounds = array<i64: 16, 256>}]} {
    %c0 = arith.constant 0 : index
    %c0_0 = arith.constant 0 : index
    %0 = vector.load %arg1[%c0, %c0_0] : memref<16x1xi32, #tpu.memory_space<vmem>>, vector<16x1xi32>
    %c0_1 = arith.constant 0 : index
    %c0_2 = arith.constant 0 : index
    %1 = vector.load %arg2[%c0_1, %c0_2] : memref<1x16xi32, #tpu.memory_space<vmem>>, vector<1x16xi32>
    %c0_3 = arith.constant 0 : index
    %c0_4 = arith.constant 0 : index
    %2 = vector.load %arg3[%c0_3, %c0_4] : memref<16x1xi32, #tpu.memory_space<vmem>>, vector<16x1xi32>
    %3 = tpu.iota {dimensions = array<i32: 1>} : vector<16x16xi32>
    %4 = vector.broadcast %0 : vector<16x1xi32> to vector<16x16xi32>
    %5 = arith.cmpi eq, %4, %3 : vector<16x16xi32>
    %6 = arith.extui %5 : vector<16x16xi1> to vector<16x16xi32>
    %7 = arith.sitofp %6 : vector<16x16xi32> to vector<16x16xf32>
    %8 = tpu.iota {dimensions = array<i32: 1>} : vector<16x16xi32>
    %9 = vector.broadcast %2 : vector<16x1xi32> to vector<16x16xi32>
    %10 = arith.cmpi eq, %9, %8 : vector<16x16xi32>
    %11 = arith.extui %10 : vector<16x16xi1> to vector<16x16xi32>
    %12 = arith.sitofp %11 : vector<16x16xi32> to vector<16x16xf32>
    %13 = tpu.iota {dimensions = array<i32: 0>} : vector<16x16xi32>
    %14 = vector.broadcast %1 : vector<1x16xi32> to vector<16x16xi32>
    %15 = arith.cmpi eq, %13, %14 : vector<16x16xi32>
    %16 = arith.extui %15 : vector<16x16xi1> to vector<16x16xi32>
    %17 = arith.sitofp %16 : vector<16x16xi32> to vector<16x16xf32>
    %18 = tpu.iota {dimensions = array<i32: 0>} : vector<16x16xi32>
    %19 = tpu.iota {dimensions = array<i32: 1>} : vector<16x16xi32>
    %20 = arith.cmpi eq, %18, %19 : vector<16x16xi32>
    %21 = arith.extui %20 : vector<16x16xi1> to vector<16x16xi32>
    %22 = arith.sitofp %21 : vector<16x16xi32> to vector<16x16xf32>
    %cst = arith.constant dense<0.000000e+00> : vector<16x16xf32>
    %23 = tpu.matmul %17, %12, %cst {dimension_numbers = #tpu.dot_dimension_numbers<[1], [0], [0], [1], [0, 0, 1, 1], [], []>} : vector<16x16xf32>, vector<16x16xf32>, vector<16x16xf32> -> vector<16x16xf32>
    %24 = arith.addf %23, %22 : vector<16x16xf32>
    %cst_5 = arith.constant dense<0.000000e+00> : vector<16xf32>
    %25 = vector.multi_reduction <add>, %24, %cst_5 [1] : vector<16x16xf32> to vector<16xf32>
    %26 = vector.shape_cast %25 : vector<16xf32> to vector<16x1xf32>
    %cst_6 = arith.constant 0.000000e+00 : f32
    %27 = vector.broadcast %cst_6 : f32 to vector<16x1xf32>
    %28 = arith.cmpf ogt, %26, %27 : vector<16x1xf32>
    %29 = math.rsqrt %26 : vector<16x1xf32>
    %cst_7 = arith.constant 0.000000e+00 : f32
    %30 = vector.broadcast %cst_7 : f32 to vector<16x1xf32>
    %31 = arith.select %28, %29, %30 : vector<16x1xi1>, vector<16x1xf32>
    %c0_8 = arith.constant 0 : index
    %c0_9 = arith.constant 0 : index
    %32 = vector.load %arg4[%c0_8, %c0_9] : memref<16x80xf32, #tpu.memory_space<vmem>>, vector<16x80xf32>
    %cst_10 = arith.constant dense<0.000000e+00> : vector<16x80xf32>
    %33 = tpu.matmul %7, %32, %cst_10 {dimension_numbers = #tpu.dot_dimension_numbers<[1], [0], [0], [1], [0, 0, 1, 1], [], []>} : vector<16x16xf32>, vector<16x80xf32>, vector<16x80xf32> -> vector<16x80xf32>
    %34 = vector.broadcast %31 : vector<16x1xf32> to vector<16x80xf32>
    %35 = arith.mulf %34, %33 : vector<16x80xf32>
    %cst_11 = arith.constant dense<0.000000e+00> : vector<16x80xf32>
    %36 = tpu.matmul %24, %35, %cst_11 {dimension_numbers = #tpu.dot_dimension_numbers<[1], [0], [0], [1], [0, 0, 1, 1], [], []>} : vector<16x16xf32>, vector<16x80xf32>, vector<16x80xf32> -> vector<16x80xf32>
    %37 = vector.broadcast %31 : vector<16x1xf32> to vector<16x80xf32>
    %38 = arith.mulf %37, %36 : vector<16x80xf32>
    %c0_12 = arith.constant 0 : index
    %c0_13 = arith.constant 0 : index
    %39 = vector.load %arg5[%c0_12, %c0_13] : memref<16x64xf32, #tpu.memory_space<vmem>>, vector<16x64xf32>
    %40 = vector.broadcast %31 : vector<16x1xf32> to vector<16x64xf32>
    %41 = arith.mulf %40, %39 : vector<16x64xf32>
    %cst_14 = arith.constant dense<0.000000e+00> : vector<16x64xf32>
    %42 = tpu.matmul %24, %41, %cst_14 {dimension_numbers = #tpu.dot_dimension_numbers<[1], [0], [0], [1], [0, 0, 1, 1], [], []>} : vector<16x16xf32>, vector<16x64xf32>, vector<16x64xf32> -> vector<16x64xf32>
    %43 = vector.broadcast %31 : vector<16x1xf32> to vector<16x64xf32>
    %44 = arith.mulf %43, %42 : vector<16x64xf32>
    %c0_15 = arith.constant 0 : index
    %c0_16 = arith.constant 0 : index
    %45 = vector.load %arg6[%c0_15, %c0_16] : memref<256x80xf32, #tpu.memory_space<vmem>>, vector<256x80xf32>
    %cst_17 = arith.constant dense<0.000000e+00> : vector<16x256xf32>
    %46 = tpu.matmul %38, %45, %cst_17 {dimension_numbers = #tpu.dot_dimension_numbers<[1], [1], [0], [0], [0, 0, 1, 0], [], []>} : vector<16x80xf32>, vector<256x80xf32>, vector<16x256xf32> -> vector<16x256xf32>
    %c0_18 = arith.constant 0 : index
    %c0_19 = arith.constant 0 : index
    %47 = vector.load %arg7[%c0_18, %c0_19] : memref<256x64xf32, #tpu.memory_space<vmem>>, vector<256x64xf32>
    %cst_20 = arith.constant dense<0.000000e+00> : vector<16x256xf32>
    %48 = tpu.matmul %44, %47, %cst_20 {dimension_numbers = #tpu.dot_dimension_numbers<[1], [1], [0], [0], [0, 0, 1, 0], [], []>} : vector<16x64xf32>, vector<256x64xf32>, vector<16x256xf32> -> vector<16x256xf32>
    %49 = arith.addf %46, %48 : vector<16x256xf32>
    %c0_21 = arith.constant 0 : index
    %c0_22 = arith.constant 0 : index
    %50 = vector.load %arg8[%c0_21, %c0_22] : memref<1x256xf32, #tpu.memory_space<vmem>>, vector<1x256xf32>
    %51 = vector.broadcast %50 : vector<1x256xf32> to vector<16x256xf32>
    %52 = arith.addf %49, %51 : vector<16x256xf32>
    %cst_23 = arith.constant 0.000000e+00 : f32
    %53 = vector.broadcast %cst_23 : f32 to vector<16x256xf32>
    %54 = arith.maximumf %52, %53 : vector<16x256xf32>
    %c0_24 = arith.constant 0 : index
    %c0_25 = arith.constant 0 : index
    %55 = vector.load %arg9[%c0_24, %c0_25] : memref<16x256xf32, #tpu.memory_space<vmem>>, vector<16x256xf32>
    tpu.vector_store %arg9[%c0_24, %c0_25], %54 {strides = array<i32>} : memref<16x256xf32, #tpu.memory_space<vmem>>, vector<16x256xf32>,
    return
  }
  func.func @transform_0(%arg0: i32) -> (i32, i32) {
    %c0_i32 = arith.constant 0 : i32
    %c0_i32_0 = arith.constant 0 : i32
    %c0_i32_1 = arith.constant 0 : i32
    return %c0_i32, %c0_i32_0 : i32, i32
  }
  func.func @transform_1(%arg0: i32) -> (i32, i32) {
    %c0_i32 = arith.constant 0 : i32
    %c0_i32_0 = arith.constant 0 : i32
    %c0_i32_1 = arith.constant 0 : i32
    return %c0_i32, %c0_i32_0 : i32, i32
  }
  func.func @transform_2(%arg0: i32) -> (i32, i32) {
    %c0_i32 = arith.constant 0 : i32
    %c0_i32_0 = arith.constant 0 : i32
    %c0_i32_1 = arith.constant 0 : i32
    return %c0_i32, %c0_i32_0 : i32, i32
  }
  func.func @transform_3(%arg0: i32) -> (i32, i32) {
    %c0_i32 = arith.constant 0 : i32
    %c0_i32_0 = arith.constant 0 : i32
    %c0_i32_1 = arith.constant 0 : i32
    return %c0_i32, %c0_i32_0 : i32, i32
  }
  func.func @transform_4(%arg0: i32) -> (i32, i32) {
    %c0_i32 = arith.constant 0 : i32
    %c0_i32_0 = arith.constant 0 : i32
    %c0_i32_1 = arith.constant 0 : i32
    return %c0_i32, %c0_i32_0 : i32, i32
  }
  func.func @transform_5(%arg0: i32) -> (i32, i32) {
    %c0_i32 = arith.constant 0 : i32
    %c0_i32_0 = arith.constant 0 : i32
    %c0_i32_1 = arith.constant 0 : i32
    return %c0_i32, %c0_i32_0 : i32, i32
  }
  func.func @transform_6(%arg0: i32) -> (i32, i32) {
    %c0_i32 = arith.constant 0 : i32
    %c0_i32_0 = arith.constant 0 : i32
    %c0_i32_1 = arith.constant 0 : i32
    return %c0_i32, %c0_i32_0 : i32, i32
  }
  func.func @transform_7(%arg0: i32) -> (i32, i32) {
    %c0_i32 = arith.constant 0 : i32
    %c0_i32_0 = arith.constant 0 : i32
    %c0_i32_1 = arith.constant 0 : i32
    return %c0_i32, %c0_i32_0 : i32, i32
  }
  func.func @transform_8(%arg0: i32) -> (i32, i32) {
    %c0_i32 = arith.constant 0 : i32
    %c0_i32_0 = arith.constant 0 : i32
    %c0_i32_1 = arith.constant 0 : i32
    return %c0_i32, %c0_i32_0 : i32, i32
  }
}

</mosaic_0001>

<bundles_post_ra>
// kernel: node_model_1.1
= control target key start
LH: loop header
LB: loop body
LE: loop exit
PB: predicated region body
PF: predicated region fallthrough
CT: control target
= control target key end

     0   :  { %v757_v1 = vmov 0   ;;  %s1137_s0 = inlined_call_operand.vmem [shape: s32[16,1], index: 0, kind: input, shape index: {}]   ;;  %s1138_s1 = inlined_call_operand.vmem [shape: s32[1,16], index: 1, kind: input, shape index: {}]   ;;  %s1139_s2 = inlined_call_operand.vmem [shape: s32[16,1], index: 2, kind: input, shape index: {}]   ;;  %s1140_s3 = inlined_call_operand.vmem [shape: f32[16,80], index: 3, kind: input, shape index: {}]   ;;  %s1141_s4 = inlined_call_operand.vmem [shape: f32[16,64], index: 4, kind: input, shape index: {}]   ;;  %s1142_s5 = inlined_call_operand.vmem [shape: f32[256,80], index: 5, kind: input, shape index: {}]   ;;  %s1143_s6 = inlined_call_operand.vmem [shape: f32[256,64], index: 6, kind: input, shape index: {}]   ;;  %s1144_s7 = inlined_call_operand.vmem [shape: f32[1,256], index: 7, kind: input, shape index: {}]   ;;  %s1145_s8 = inlined_call_operand.hbm [shape: f32[16,256], index: 8, kind: output, shape index: {}]  }
   0x1   :  { %v34_v0 = vld [vmem:[%s1139_s2 + $0x8] sm:$0xff]  ;;  %724 = vset.pattern.permute.xlu0 %v757_v1  ;;  %725 = vset.pattern.permute.xlu1 %v757_v1 }
   0x2   :  { %13 = vsyncpa [#allocation3], 0  ;;  %53 = vperm.xlu0 %724, %v34_v0   ;;  %v33_v2 = vld [vmem:[%s1139_s2] sm:$0xff]  ;;  %v35_v4 = vlaneseq  ;;  %v31_v5 = vld [vmem:[%s1137_s0 + $0x8] sm:$0xff]  ;;  %v758_v10 = vmov 1.0   ;;  %v759_v12 = vmov 0.0  }
   0x3   :  { %v30_v3 = vld [vmem:[%s1137_s0] sm:$0xff]  ;;  %vm77_vm2 = vcmask 130048   ;;  %v138_v16 = vld [vmem:[%s1140_s3 + $0x8] sm:$0xff]  ;;  %v277_v32 = vld [vmem:[%s1143_s6 + $0x78] sm:$0xff]  ;;  %vm294_vm9 = vcmask 523264   ;;  %s616_s16 = sshll.u32 %s1145_s8, 4  ;;  %s617_s16 = int_to_ptr.hbm [resolvable:$true] %s616_s16 }
   0x4   :  { %38 = vperm.xlu1 %725, %v30_v3   ;;  %v36_v6 = vand.u32 127, %v35_v4  ;;  %v62_v8 = vshrl.u32 %v35_v4, 7  ;;  %v726_v9 = vld [vmem:[%s1138_s1] ss:$0 sm:$0xff]  ;;  %159 = vmatpush.msra.mxu1 %v138_v16  ;;  %v293_v33 = vld [vmem:[%s1143_s6 + $0xf8] sm:$0xff]  ;;  %v276_v37 = vld [vmem:[%s1143_s6 + $0x70] sm:$0xff] }
   0x5   :  { %v137_v18 = vld [vmem:[%s1140_s3] sm:$0xff]  ;;  %v292_v38 = vld [vmem:[%s1143_s6 + $0xf0] sm:$0xff]  ;;  %v275_v41 = vld [vmem:[%s1143_s6 + $0x68] sm:$0xff]  ;;  %s762_s17 = smov 16  }
   0x6   :  { %vm65_vm1 = vcmp.eq.s32.totalorder %v62_v8, %v726_v9  ;;  %v63_v14 = vadd.s32 8, %v62_v8  ;;  %160 = vmatpush.msra.mxu1 %v137_v18  ;;  %vm71_vm8 = vcmp.eq.s32.totalorder %v62_v8, %v36_v6  ;;  %v291_v42 = vld [vmem:[%s1143_s6 + $0xe8] sm:$0xff]  ;;  %v274_v48 = vld [vmem:[%s1143_s6 + $0x60] sm:$0xff]  ;;  %v273_v57 = vld [vmem:[%s1143_s6 + $0x58] sm:$0xff] }
   0x7   :  { %v632_v13 = vsel %vm65_vm1, 1.0, %v759_v12  ;;  %v634_v27 = vsel %vm71_vm8, 1.0, %v759_v12  ;;  %v202_v47 = vld [vmem:[%s1141_s4 + $0x8] sm:$0xff]  ;;  %v290_v49 = vld [vmem:[%s1143_s6 + $0xe0] sm:$0xff]  ;;  %v289_v58 = vld [vmem:[%s1143_s6 + $0xd8] sm:$0xff] }
   0x8   :  { %vm66_vm4 = vcmp.eq.s32.totalorder %v63_v14, %v726_v9  ;;  %vm72_vm7 = vcmp.eq.s32.totalorder %v63_v14, %v36_v6  ;;  %664 = vmatpush.xpose.msk.msrb.mxu1 %vm294_vm9, %v293_v33  ;;  %v201_v61 = vld [vmem:[%s1141_s4] sm:$0xff]  ;;  %v272_v62 = vld [vmem:[%s1143_s6 + $0x50] sm:$0xff]  ;;  %v245_v4 = vld [vmem:[%s1142_s5 + $0x78] sm:$0xff]  ;;  %s761_s4 = smov 256  }
   0x9   :  { %v633_v15 = vsel %vm66_vm4, 1.0, %v759_v12  ;;  %v635_v23 = vsel %vm72_vm7, 1.0, %v759_v12  ;;  %v288_v63 = vld [vmem:[%s1143_s6 + $0xd0] sm:$0xff]  ;;  %v269_v14 = vld [vmem:[%s1143_s6 + $0x38] sm:$0xff]  ;;  %v242_v16 = vld [vmem:[%s1142_s5 + $0x60] sm:$0xff] }
   0xa   :  { %50 = vperm.xlu0 %724, %v33_v2   ;;  %v244_v8 = vld [vmem:[%s1142_s5 + $0x70] sm:$0xff]  ;;  %v254_v33 = vld [vmem:[%s1142_s5 + $0xc0] sm:$0xff] }
   0xb   :  { %v260_v9 = vld [vmem:[%s1142_s5 + $0xf0] sm:$0xff] }
   0xc   :  { %41 = vperm.xlu1 %725, %v31_v5   ;;  %665 = vmatpush.xpose.msk.msrb.mxu1 %vm294_vm9, %v292_v38  ;;  %v261_v5 = vld [vmem:[%s1142_s5 + $0xf8] sm:$0xff]  ;;  %v268_v18 = vld [vmem:[%s1143_s6 + $0x30] sm:$0xff]  ;;  %v263_v38 = vld [vmem:[%s1143_s6 + $0x8] sm:$0xff] }
  0x10   :  { %666 = vmatpush.xpose.msk.msrb.mxu1 %vm294_vm9, %v291_v42  ;;  %v235_v42 = vld [vmem:[%s1142_s5 + $0x28] sm:$0xff] }
  0x14   :  { %667 = vmatpush.xpose.msk.msrb.mxu1 %vm294_vm9, %v290_v49  ;;  %v248_v49 = vld [vmem:[%s1142_s5 + $0x90] sm:$0xff] }
  0x18   :  { %668 = vmatpush.xpose.msk.msrb.mxu1 %vm294_vm9, %v289_v58 }
  0x1c   :  { %669 = vmatpush.xpose.msk.msrb.mxu1 %vm294_vm9, %v288_v63 }
  0x74   :  { %v54_v7 = vpop.permute.xlu0 %53 }
  0x75   :  { %vm56_vm0 = vcmp.eq.s32.totalorder %v54_v7, %v36_v6  ;;  %v287_v7 = vld [vmem:[%s1143_s6 + $0xc8] sm:$0xff] }
  0x76   :  { %636 = vmatpush.msk.msra.mxu0 %vm56_vm0, %v758_v10  ;;  %v39_v17 = vpop.permute.xlu1 %38  ;;  %670 = vmatpush.xpose.msk.msrb.mxu1 %vm294_vm9, %v287_v7 }
  0x77   :  { %vm43_vm5 = vcmp.eq.s32.totalorder %v39_v17, %v36_v6  ;;  %v258_v17 = vld [vmem:[%s1142_s5 + $0xe0] sm:$0xff] }
  0x78   :  { %v628_v19 = vsel %vm43_vm5, 1.0, %v759_v12 }
  0x79   :  { %640 = vmatmul.msk.f32.vlgmr.msra.gmra.mxu1 %vm77_vm2, %v628_v19  ;;  %v284_v19 = vld [vmem:[%s1143_s6 + $0xb0] sm:$0xff] }
  0x7c   :  { %v51_v11 = vpop.permute.xlu0 %50 }
  0x7d   :  { %vm55_vm3 = vcmp.eq.s32.totalorder %v51_v11, %v36_v6  ;;  %v286_v11 = vld [vmem:[%s1143_s6 + $0xc0] sm:$0xff] }
  0x7e   :  { %637 = vmatpush.msk.msra.mxu0 %vm55_vm3, %v758_v10  ;;  %v42_v20 = vpop.permute.xlu1 %41  ;;  %vm443_vm3 = vcmask 654336   ;;  %v270_v10 = vld [vmem:[%s1143_s6 + $0x40] sm:$0xff]  ;;  %671 = vmatpush.xpose.msk.msrb.mxu1 %vm294_vm9, %v286_v11 }
  0x7f   :  { %638 = vmatmul.msk.f32.vlgmr.msra.gmra.mxu0 %vm77_vm2, %v632_v13  ;;  %vm44_vm6 = vcmp.eq.s32.totalorder %v42_v20, %v36_v6  ;;  %v271_v6 = vld [vmem:[%s1143_s6 + $0x48] sm:$0xff]  ;;  %v241_v20 = vld [vmem:[%s1142_s5 + $0x58] sm:$0xff] }
  0x80   :  { %v629_v21 = vsel %vm44_vm6, 1.0, %v759_v12  ;;  %646 = vmatpush.xpose.msk.msrb.mxu0 %vm294_vm9, %v277_v32  ;;  %v243_v12 = vld [vmem:[%s1142_s5 + $0x68] sm:$0xff]  ;;  %v238_v32 = vld [vmem:[%s1142_s5 + $0x40] sm:$0xff] }
  0x81   :  { %641 = vmatmul.msk.f32.gmra.mxu1 %vm77_vm2, %v629_v21  ;;  %v259_v13 = vld [vmem:[%s1142_s5 + $0xe8] sm:$0xff]  ;;  %v257_v21 = vld [vmem:[%s1142_s5 + $0xd8] sm:$0xff] }
  0x84   :  { %647 = vmatpush.xpose.msk.msrb.mxu0 %vm294_vm9, %v276_v37  ;;  %v253_v37 = vld [vmem:[%s1142_s5 + $0xb8] sm:$0xff] }
  0x87   :  { %639 = vmatmul.msk.f32.gmra.mxu0 %vm77_vm2, %v633_v15  ;;  %v285_v15 = vld [vmem:[%s1143_s6 + $0xb8] sm:$0xff] }
  0x88   :  { %648 = vmatpush.xpose.msk.msrb.mxu0 %vm294_vm9, %v275_v41  ;;  %672 = vmatpush.xpose.msk.msrb.mxu1 %vm294_vm9, %v285_v15  ;;  %v252_v41 = vld [vmem:[%s1142_s5 + $0xb0] sm:$0xff] }
  0x8c   :  { %649 = vmatpush.xpose.msk.msrb.mxu0 %vm294_vm9, %v274_v48  ;;  %673 = vmatpush.xpose.msk.msrb.mxu1 %vm294_vm9, %v284_v19  ;;  %v232_v48 = vld [vmem:[%s1142_s5 + $0x10] sm:$0xff] }
  0x90   :  { %650 = vmatpush.xpose.msk.msrb.mxu0 %vm294_vm9, %v273_v57 }
  0x94   :  { %651 = vmatpush.xpose.msk.msrb.mxu0 %vm294_vm9, %v272_v62 }
  0x98   :  { %652 = vmatpush.xpose.msk.msrb.mxu0 %vm294_vm9, %v271_v6 }
  0x9c   :  { %653 = vmatpush.xpose.msk.msrb.mxu0 %vm294_vm9, %v270_v10 }
  0xa0   :  { %654 = vmatpush.xpose.msk.msrb.mxu0 %vm294_vm9, %v269_v14 }
  0xa4   :  { %655 = vmatpush.xpose.msk.msrb.mxu0 %vm294_vm9, %v268_v18 }
  0xf6   :  { %v162_v36 = vpop.f32.mrf.mxu1 }
  0xfc   :  { %v101_v22 = vpop.f32.mrf.mxu0 }
  0xfd   :  { %v837_v28 = vadd.f32 %v634_v27, %v101_v22  ;;  %v267_v22 = vld [vmem:[%s1143_s6 + $0x28] sm:$0xff]  ;;  %v282_v27 = vld [vmem:[%s1143_s6 + $0xa0] sm:$0xff] }
  0xfe   :  { %v165_v52 = vpop.f32.mrf.mxu1  ;;  %656 = vmatpush.xpose.msk.msrb.mxu0 %vm294_vm9, %v267_v22 }
  0xff   :  { %v107_v29 = vsel %vm77_vm2, %v837_v28, 0.0 }
 0x104   :  { %v104_v24 = vpop.f32.mrf.mxu0 }
 0x105   :  { %v833_v25 = vadd.f32 %v635_v23, %v104_v24  ;;  %v283_v23 = vld [vmem:[%s1143_s6 + $0xa8] sm:$0xff]  ;;  %v240_v24 = vld [vmem:[%s1142_s5 + $0x50] sm:$0xff] }
 0x106   :  { %674 = vmatpush.xpose.msk.msrb.mxu1 %vm294_vm9, %v283_v23 }
 0x107   :  { %v110_v26 = vsel %vm77_vm2, %v833_v25, 0.0 }
 0x108   :  { %111 = vadd.xlane.f32.xlu2 %v110_v26  ;;  %v266_v26 = vld [vmem:[%s1143_s6 + $0x20] sm:$0xff] }
 0x109   :  { %657 = vmatpush.xpose.msk.msrb.mxu0 %vm294_vm9, %v266_v26 }
 0x10a   :  { %675 = vmatpush.xpose.msk.msrb.mxu1 %vm294_vm9, %v282_v27 }
 0x110   :  { %108 = vadd.xlane.f32.xlu2 %v107_v29  ;;  %v255_v29 = vld [vmem:[%s1142_s5 + $0xc8] sm:$0xff] }
 0x17b   :  { %v112_v30 = vpop.xlane.xlu2 %111 }
 0x17c   :  { %727 = vrsqrt.f32 %v112_v30  ;;  %vm131_vm11 = vweird.f32 %v112_v30  ;;  %vm114_vm13 = vcmp.gt.f32.partialorder %v112_v30, 0.0 }
 0x182   :  { %v728_v31 = vpop.eup %727 }
 0x183   :  { %v126_v34 = vmul.f32 %v728_v31, %v112_v30  ;;  %v109_v35 = vpop.xlane.xlu2 %108  ;;  %vm132_vm10 = vweird.f32 %v728_v31  ;;  %v265_v30 = vld [vmem:[%s1143_s6 + $0x18] sm:$0xff] }
 0x184   :  { %729 = vrsqrt.f32 %v109_v35  ;;  %vm133_vm12 = vmor %vm131_vm11, %vm132_vm10  ;;  %vm121_vm15 = vweird.f32 %v109_v35  ;;  %vm113_vm1 = vcmp.gt.f32.partialorder %v109_v35, 0.0  ;;  %658 = vmatpush.xpose.msk.msrb.mxu0 %vm294_vm9, %v265_v30 }
 0x185   :  { %v127_v39 = vmul.f32 %v728_v31, %v126_v34  ;;  %v264_v34 = vld [vmem:[%s1143_s6 + $0x10] sm:$0xff] }
 0x187   :  { %v128_v40 = vmul.f32 0.5, %v127_v39  ;;  %v279_v39 = vld [vmem:[%s1143_s6 + $0x88] sm:$0xff] }
 0x188   :  { %659 = vmatpush.xpose.msk.msrb.mxu0 %vm294_vm9, %v264_v34 }
 0x189   :  { %v129_v43 = vsub.f32 1.5, %v128_v40  ;;  %v236_v40 = vld [vmem:[%s1142_s5 + $0x30] sm:$0xff] }
 0x18a   :  { %v730_v44 = vpop.eup %729 }
 0x18b   :  { %v116_v45 = vmul.f32 %v730_v44, %v109_v35  ;;  %v130_v46 = vmul.f32 %v728_v31, %v129_v43  ;;  %vm122_vm14 = vweird.f32 %v730_v44  ;;  %v280_v35 = vld [vmem:[%s1143_s6 + $0x90] sm:$0xff]  ;;  %v251_v43 = vld [vmem:[%s1142_s5 + $0xa8] sm:$0xff] }
 0x18c   :  { %vm123_vm0 = vmor %vm121_vm15, %vm122_vm14  ;;  %660 = vmatpush.xpose.msk.msrb.mxu0 %vm294_vm9, %v263_v38 }
 0x18d   :  { %v117_v50 = vmul.f32 %v730_v44, %v116_v45  ;;  %v134_v51 = vsel %vm133_vm12, %v728_v31, %v130_v46  ;;  %v281_v31 = vld [vmem:[%s1143_s6 + $0x98] sm:$0xff]  ;;  %v250_v45 = vld [vmem:[%s1142_s5 + $0xa0] sm:$0xff] }
 0x18e   :  { %v874_v53 = vsel %vm114_vm13, %v134_v51, 0.0  ;;  %676 = vmatpush.xpose.msk.msrb.mxu1 %vm294_vm9, %v281_v31  ;;  %v233_v46 = vld [vmem:[%s1142_s5 + $0x18] sm:$0xff]  ;;  %v247_v51 = vld [vmem:[%s1142_s5 + $0x88] sm:$0xff] }
 0x18f   :  { %v118_v54 = vmul.f32 0.5, %v117_v50  ;;  %v169_v55 = vmul.f32 %v165_v52, %v874_v53  ;;  %v204_v56 = vmul.f32 %v202_v47, %v874_v53  ;;  %v249_v47 = vld [vmem:[%s1142_s5 + $0x98] sm:$0xff]  ;;  %v231_v50 = vld [vmem:[%s1142_s5 + $0x8] sm:$0xff]  ;;  %v262_v52 = vld [vmem:[%s1143_s6] sm:$0xff] }
 0x190   :  { %661 = vmatpush.xpose.msk.msrb.mxu0 %vm294_vm9, %v262_v52 }
 0x191   :  { %v119_v59 = vsub.f32 1.5, %v118_v54  ;;  %190 = vmatpush.msra.mxu2 %v169_v55  ;;  %219 = vmatpush.msra.mxu3 %v204_v56  ;;  %v278_v54 = vld [vmem:[%s1143_s6 + $0x80] sm:$0xff] }
 0x192   :  { %677 = vmatpush.xpose.msk.msrb.mxu1 %vm294_vm9, %v280_v35  ;;  %v230_v55 = vld [vmem:[%s1142_s5] sm:$0xff] }
 0x193   :  { %v120_v60 = vmul.f32 %v730_v44, %v119_v59  ;;  %v246_v56 = vld [vmem:[%s1142_s5 + $0x80] sm:$0xff] }
 0x195   :  { %v124_v0 = vsel %vm123_vm0, %v730_v44, %v120_v60  ;;  %v234_v44 = vld [vmem:[%s1142_s5 + $0x20] sm:$0xff] }
 0x196   :  { %v897_v1 = vsel %vm113_vm1, %v124_v0, 0.0  ;;  %678 = vmatpush.xpose.msk.msrb.mxu1 %vm294_vm9, %v279_v39 }
 0x197   :  { %v168_v2 = vmul.f32 %v162_v36, %v897_v1  ;;  %v203_v3 = vmul.f32 %v201_v61, %v897_v1  ;;  %v237_v36 = vld [vmem:[%s1142_s5 + $0x38] sm:$0xff] }
 0x199   :  { %191 = vmatpush.msra.mxu2 %v168_v2  ;;  %220 = vmatpush.msra.mxu3 %v203_v3 }
 0x19a   :  { %642 = vmatmul.msk.f32.vlgmr.msra.gmra.mxu2 %vm77_vm2, %v837_v28  ;;  %644 = vmatmul.msk.f32.vlgmr.msra.gmra.mxu3 %vm77_vm2, %v837_v28  ;;  %v239_v28 = vld [vmem:[%s1142_s5 + $0x48] sm:$0xff] }
 0x19b   :  { %682 = vmatpush.xpose.msk.msrb.mxu2 %vm443_vm3, %v245_v4  ;;  %700 = vmatpush.xpose.msk.msrb.mxu3 %vm443_vm3, %v261_v5 }
 0x19c   :  { %679 = vmatpush.xpose.msk.msrb.mxu1 %vm294_vm9, %v278_v54 }
 0x19f   :  { %683 = vmatpush.xpose.msk.msrb.mxu2 %vm443_vm3, %v244_v8  ;;  %701 = vmatpush.xpose.msk.msrb.mxu3 %vm443_vm3, %v260_v9 }
 0x1a2   :  { %643 = vmatmul.msk.f32.gmra.mxu2 %vm77_vm2, %v833_v25  ;;  %645 = vmatmul.msk.f32.gmra.mxu3 %vm77_vm2, %v833_v25  ;;  %v256_v25 = vld [vmem:[%s1142_s5 + $0xd0] sm:$0xff] }
 0x1a3   :  { %684 = vmatpush.xpose.msk.msrb.mxu2 %vm443_vm3, %v243_v12  ;;  %702 = vmatpush.xpose.msk.msrb.mxu3 %vm443_vm3, %v259_v13 }
 0x1a7   :  { %685 = vmatpush.xpose.msk.msrb.mxu2 %vm443_vm3, %v242_v16  ;;  %703 = vmatpush.xpose.msk.msrb.mxu3 %vm443_vm3, %v258_v17 }
 0x1ab   :  { %686 = vmatpush.xpose.msk.msrb.mxu2 %vm443_vm3, %v241_v20  ;;  %704 = vmatpush.xpose.msk.msrb.mxu3 %vm443_vm3, %v257_v21 }
 0x1af   :  { %687 = vmatpush.xpose.msk.msrb.mxu2 %vm443_vm3, %v240_v24  ;;  %705 = vmatpush.xpose.msk.msrb.mxu3 %vm443_vm3, %v256_v25 }
 0x1b3   :  { %688 = vmatpush.xpose.msk.msrb.mxu2 %vm443_vm3, %v239_v28  ;;  %706 = vmatpush.xpose.msk.msrb.mxu3 %vm443_vm3, %v255_v29 }
 0x1b7   :  { %689 = vmatpush.xpose.msk.msrb.mxu2 %vm443_vm3, %v238_v32  ;;  %707 = vmatpush.xpose.msk.msrb.mxu3 %vm443_vm3, %v254_v33 }
 0x1bb   :  { %690 = vmatpush.xpose.msk.msrb.mxu2 %vm443_vm3, %v237_v36  ;;  %708 = vmatpush.xpose.msk.msrb.mxu3 %vm443_vm3, %v253_v37 }
 0x1bf   :  { %691 = vmatpush.xpose.msk.msrb.mxu2 %vm443_vm3, %v236_v40  ;;  %709 = vmatpush.xpose.msk.msrb.mxu3 %vm443_vm3, %v252_v41 }
 0x1c3   :  { %692 = vmatpush.xpose.msk.msrb.mxu2 %vm443_vm3, %v235_v42  ;;  %710 = vmatpush.xpose.msk.msrb.mxu3 %vm443_vm3, %v251_v43 }
 0x1c7   :  { %693 = vmatpush.xpose.msk.msrb.mxu2 %vm443_vm3, %v234_v44  ;;  %711 = vmatpush.xpose.msk.msrb.mxu3 %vm443_vm3, %v250_v45 }
 0x1cb   :  { %694 = vmatpush.xpose.msk.msrb.mxu2 %vm443_vm3, %v233_v46  ;;  %712 = vmatpush.xpose.msk.msrb.mxu3 %vm443_vm3, %v249_v47 }
 0x1cf   :  { %695 = vmatpush.xpose.msk.msrb.mxu2 %vm443_vm3, %v232_v48  ;;  %713 = vmatpush.xpose.msk.msrb.mxu3 %vm443_vm3, %v248_v49 }
 0x1d3   :  { %696 = vmatpush.xpose.msk.msrb.mxu2 %vm443_vm3, %v231_v50  ;;  %714 = vmatpush.xpose.msk.msrb.mxu3 %vm443_vm3, %v247_v51 }
 0x1d7   :  { %697 = vmatpush.xpose.msk.msrb.mxu2 %vm443_vm3, %v230_v55  ;;  %715 = vmatpush.xpose.msk.msrb.mxu3 %vm443_vm3, %v246_v56 }
 0x21d   :  { %v193_v57 = vpop.f32.mrf.mxu2  ;;  %v222_v58 = vpop.f32.mrf.mxu3 }
 0x21e   :  { %v199_v59 = vmul.f32 %v193_v57, %v897_v1  ;;  %v228_v60 = vmul.f32 %v222_v58, %v897_v1  ;;  %v592_v1 = vld [vmem:[%s1144_s7] sm:$0x3]  ;;  %s760_s7 = smov [#allocation2]  }
 0x21f   :  { %v594_v4 = vperm.slane %v592_v1, 0  ;;  %v595_v5 = vperm.slane %v592_v1, 1  ;;  %s614_s1 = sshll.u32 %s760_s7, 4  ;;  %s615_s1 = int_to_ptr.vmem [resolvable:$true] %s614_s1 }
 0x220   :  { %662 = vmatmul.msk.f32.vlgmr.msrb.gmra.mxu0 %vm294_vm9, %v228_v60  ;;  %680 = vmatmul.msk.f32.vlgmr.msrb.gmra.mxu1 %vm294_vm9, %v228_v60 }
 0x221   :  { %698 = vmatmul.msk.f32.vlgmr.msrb.gmra.mxu2 %vm443_vm3, %v199_v59  ;;  %716 = vmatmul.msk.f32.vlgmr.msrb.gmra.mxu3 %vm443_vm3, %v199_v59 }
 0x225   :  { %v196_v61 = vpop.f32.mrf.mxu2  ;;  %v225_v62 = vpop.f32.mrf.mxu3 }
 0x226   :  { %v200_v63 = vmul.f32 %v196_v61, %v874_v53  ;;  %v229_v0 = vmul.f32 %v225_v62, %v874_v53 }
 0x228   :  { %663 = vmatmul.msk.f32.gmra.mxu0 %vm294_vm9, %v229_v0  ;;  %681 = vmatmul.msk.f32.gmra.mxu1 %vm294_vm9, %v229_v0 }
 0x229   :  { %699 = vmatmul.msk.f32.gmra.mxu2 %vm443_vm3, %v200_v63  ;;  %717 = vmatmul.msk.f32.gmra.mxu3 %vm443_vm3, %v200_v63 }
 0x29d   :  { %v414_v2 = vpop.f32.mrf.mxu0  ;;  %v437_v3 = vpop.f32.mrf.mxu1 }
 0x2a4   :  { %v563_v6 = vpop.f32.mrf.mxu2  ;;  %v586_v7 = vpop.f32.mrf.mxu3 }
 0x2a5   :  { %v564_v8 = vadd.f32 %v563_v6, %v414_v2  ;;  %v587_v53 = vadd.f32 %v586_v7, %v437_v3  ;;  %v417_v13 = vpop.f32.mrf.mxu0  ;;  %v440_v14 = vpop.f32.mrf.mxu1 }
 0x2a7   :  { %v598_v9 = vadd.f32 %v594_v4, %v564_v8  ;;  %v599_v10 = vadd.f32 %v595_v5, %v587_v53 }
 0x2a9   :  { %v602_v11 = vmax.f32 %v598_v9, 0.0  ;;  %v603_v12 = vmax.f32 %v599_v10, 0.0 }
 0x2ab   :  { %606 = vst [vmem:[#allocation2] sm:$0xff] %v602_v11 }
 0x2ac   :  { %607 = vst [vmem:[#allocation2 + $0x8] sm:$0xff] %v603_v12  ;;  %v566_v15 = vpop.f32.mrf.mxu2  ;;  %v589_v16 = vpop.f32.mrf.mxu3 }
 0x2ad   :  { %v567_v17 = vadd.f32 %v566_v15, %v417_v13  ;;  %v590_v18 = vadd.f32 %v589_v16, %v440_v14 }
 0x2af   :  { %v600_v19 = vadd.f32 %v594_v4, %v567_v17  ;;  %v601_v20 = vadd.f32 %v595_v5, %v590_v18 }
 0x2b1   :  { %v604_v21 = vmax.f32 %v600_v19, 0.0  ;;  %v605_v22 = vmax.f32 %v601_v20, 0.0 }
 0x2b3   :  { %608 = vst [vmem:[#allocation2 + $0x10] sm:$0xff] %v604_v21 }
 0x2b4   :  { %609 = vst [vmem:[#allocation2 + $0x18] sm:$0xff] %v605_v22 }
 0x2b5   :  { %622 = dma.vmem_to_hbm [thread:$0]  %s615_s1, 512, %s617_s16, [#allocation3], %s761_s4, %s761_s4, %s762_s17  }
 0x2b6   :  { %755 = dma.done.wait [#allocation3], 512  }
 0x2b7   :  { %756 = vsyncadd [#allocation3], 4294966784 }
 0x2b8   :  { %627 = vsyncpa [#allocation3], 1 }

</bundles_post_ra>
